<compile_context>
chip_gen: v5e
topology: v5e:2x2
jax: 0.10.0
libtpu: 0.0.40
codegen_flags: <defaults>
</compile_context>

<pallas_src>
import jax
import jax.numpy as jnp
from jax.experimental import pallas as pl
from jax.experimental.pallas import tpu as pltpu

EPS = 1e-5
NEG_SLOPE = 0.01  # nn.LeakyReLU() default


def _leaky_relu(x):
    return jnp.where(x > 0, x, NEG_SLOPE * x)


def _round_up(n, m):
    return ((n + m - 1) // m) * m


def _pad_last(a, target):
    pad = target - a.shape[-1]
    if pad == 0:
        return a
    cfg = [(0, 0)] * (a.ndim - 1) + [(0, pad)]
    return jnp.pad(a, cfg)


def residual_block_kernel(x_ref, w1_ref, w2_ref, pd_ref, ph_ref, o_ref):
    # Whole (padded, lane-dense) problem resident in VMEM; single grid point.
    # pd_ref rows: 0=gamma1, 1=beta1, 2=bias2   (width Dp)
    # ph_ref rows: 0=bias1,  1=gamma2, 2=beta2  (width Hp)
    x = x_ref[...]                                            # (B, Dp) f32

    g1 = pd_ref[0:1, :]
    be1 = pd_ref[1:2, :]
    b2 = pd_ref[2:3, :]
    b1 = ph_ref[0:1, :]
    g2 = ph_ref[1:2, :]
    be2 = ph_ref[2:3, :]

    # ---- BatchNorm1d #1 folded into scale/shift (batch stats, biased var) ----
    mean1 = jnp.mean(x, axis=0, keepdims=True)                # (1, Dp)
    xc = x - mean1
    var1 = jnp.mean(xc * xc, axis=0, keepdims=True)
    scale1 = g1 * jax.lax.rsqrt(var1 + EPS)                   # EUP rsqrt
    shift1 = be1 - mean1 * scale1
    h = x * scale1 + shift1

    # ---- LeakyReLU ----
    h = _leaky_relu(h)

    # ---- Linear 1: (B, Dp) @ (Dp, Hp) + b1 ----
    # (keep f32 here; cast operands to bf16 for v6e/v7x at production sizes)
    h = jnp.dot(h, w1_ref[...], preferred_element_type=jnp.float32) + b1

    # ---- BatchNorm1d #2 folded into scale/shift ----
    mean2 = jnp.mean(h, axis=0, keepdims=True)                # (1, Hp)
    hc = h - mean2
    var2 = jnp.mean(hc * hc, axis=0, keepdims=True)
    scale2 = g2 * jax.lax.rsqrt(var2 + EPS)
    shift2 = be2 - mean2 * scale2
    h = h * scale2 + shift2

    # ---- LeakyReLU ----
    h = _leaky_relu(h)

    # ---- Dropout: identity (eval-mode) ----

    # ---- Linear 2: (B, Hp) @ (Hp, Dp) + b2, then residual ----
    out = jnp.dot(h, w2_ref[...], preferred_element_type=jnp.float32) + b2
    o_ref[...] = out + x                                       # unmasked lane-dense store


def residual_block(x, w1, b1, w2, b2, g1, be1, g2, be2):
    """x: (B, D_in); w1: (D_in, H); w2: (H, D_in); 1-row vectors for b/g/beta."""
    B, D = x.shape
    H = w1.shape[1]
    Dp = _round_up(D, 128)   # lane-dense feature width
    Hp = _round_up(H, 128)   # lane-dense hidden width

    # Zero-pad to lane-dense widths (exact: padded channels never influence
    # real outputs; see header comment).
    x_p = _pad_last(x, Dp)
    w1_p = jnp.pad(w1, ((0, Dp - D), (0, Hp - H)))
    w2_p = jnp.pad(w2, ((0, Hp - H), (0, Dp - D)))

    # Pack the six 1-row parameter vectors into two (8, lane-dense) buffers.
    pd = jnp.concatenate(
        [_pad_last(g1, Dp), _pad_last(be1, Dp), _pad_last(b2, Dp)], axis=0)
    pd = jnp.pad(pd, ((0, 8 - pd.shape[0]), (0, 0)))           # (8, Dp)
    ph = jnp.concatenate(
        [_pad_last(b1, Hp), _pad_last(g2, Hp), _pad_last(be2, Hp)], axis=0)
    ph = jnp.pad(ph, ((0, 8 - ph.shape[0]), (0, 0)))           # (8, Hp)

    vmem = pl.BlockSpec(memory_space=pltpu.MemorySpace.VMEM)
    out_p = pl.pallas_call(
        residual_block_kernel,
        out_shape=jax.ShapeDtypeStruct((B, Dp), x.dtype),
        in_specs=[vmem] * 5,
        out_specs=vmem,
    )(x_p, w1_p, w2_p, pd, ph)
    return out_p[:, :D]


def reference(x, w1, b1, w2, b2, g1, be1, g2, be2):
    mean1 = jnp.mean(x, axis=0, keepdims=True)
    var1 = jnp.mean((x - mean1) ** 2, axis=0, keepdims=True)
    h = (x - mean1) / jnp.sqrt(var1 + EPS) * g1 + be1
    h = jnp.where(h > 0, h, NEG_SLOPE * h)
    h = h @ w1 + b1
    mean2 = jnp.mean(h, axis=0, keepdims=True)
    var2 = jnp.mean((h - mean2) ** 2, axis=0, keepdims=True)
    h = (h - mean2) / jnp.sqrt(var2 + EPS) * g2 + be2
    h = jnp.where(h > 0, h, NEG_SLOPE * h)
    h = h @ w2 + b2
    return h + x


if __name__ == "__main__":
    batch, input_dim, hidden_dim = 8, 16, 32
    key = jax.random.PRNGKey(0)
    kx, k1, k2, kb1, kb2 = jax.random.split(key, 5)

    x = jax.random.normal(kx, (batch, input_dim), jnp.float32)

    # nn.Linear(input_dim, hidden_dim): weight (H, D_in) -> pre-transposed (D_in, H)
    bound1 = 1.0 / jnp.sqrt(input_dim)
    w1 = jax.random.uniform(k1, (input_dim, hidden_dim), jnp.float32, -bound1, bound1)
    b1 = jax.random.uniform(kb1, (1, hidden_dim), jnp.float32, -bound1, bound1)

    # nn.Linear(hidden_dim, input_dim): weight (D_in, H) -> pre-transposed (H, D_in)
    bound2 = 1.0 / jnp.sqrt(hidden_dim)
    w2 = jax.random.uniform(k2, (hidden_dim, input_dim), jnp.float32, -bound2, bound2)
    b2 = jax.random.uniform(kb2, (1, input_dim), jnp.float32, -bound2, bound2)

    # BatchNorm affine params: default init gamma=1, beta=0
    g1 = jnp.ones((1, input_dim), jnp.float32)
    be1 = jnp.zeros((1, input_dim), jnp.float32)
    g2 = jnp.ones((1, hidden_dim), jnp.float32)
    be2 = jnp.zeros((1, hidden_dim), jnp.float32)

    out = residual_block(x, w1, b1, w2, b2, g1, be1, g2, be2)
    out = jax.block_until_ready(out)

    ref = reference(x, w1, b1, w2, b2, g1, be1, g2, be2)
    assert out.shape == (batch, input_dim)
    assert jnp.allclose(out, ref, atol=1e-4, rtol=1e-4), "mismatch vs JAX reference"

    print("KERNEL_OK")
</pallas_src>

<mosaic_0001>
module attributes {stable_mosaic.version = 11 : i64} {
  func.func @residual_block_kernel(%arg0: memref<8x128xf32, #tpu.memory_space<vmem>>, %arg1: memref<128x128xf32, #tpu.memory_space<vmem>>, %arg2: memref<128x128xf32, #tpu.memory_space<vmem>>, %arg3: memref<8x128xf32, #tpu.memory_space<vmem>>, %arg4: memref<8x128xf32, #tpu.memory_space<vmem>>, %arg5: memref<8x128xf32, #tpu.memory_space<vmem>>) attributes {dimension_semantics = [], scalar_prefetch = 0 : i64, scratch_operands = 0 : i64, tpu.core_type = #tpu.core_type<tc>} {
    %c0 = arith.constant 0 : index
    %c0_0 = arith.constant 0 : index
    %0 = vector.load %arg0[%c0, %c0_0] : memref<8x128xf32, #tpu.memory_space<vmem>>, vector<8x128xf32>
    %c0_1 = arith.constant 0 : index
    %c0_2 = arith.constant 0 : index
    %1 = vector.load %arg3[%c0_1, %c0_2] : memref<8x128xf32, #tpu.memory_space<vmem>>, vector<1x128xf32>
    %c1 = arith.constant 1 : index
    %c0_3 = arith.constant 0 : index
    %2 = vector.load %arg3[%c1, %c0_3] : memref<8x128xf32, #tpu.memory_space<vmem>>, vector<1x128xf32>
    %c2 = arith.constant 2 : index
    %c0_4 = arith.constant 0 : index
    %3 = vector.load %arg3[%c2, %c0_4] : memref<8x128xf32, #tpu.memory_space<vmem>>, vector<1x128xf32>
    %c0_5 = arith.constant 0 : index
    %c0_6 = arith.constant 0 : index
    %4 = vector.load %arg4[%c0_5, %c0_6] : memref<8x128xf32, #tpu.memory_space<vmem>>, vector<1x128xf32>
    %c1_7 = arith.constant 1 : index
    %c0_8 = arith.constant 0 : index
    %5 = vector.load %arg4[%c1_7, %c0_8] : memref<8x128xf32, #tpu.memory_space<vmem>>, vector<1x128xf32>
    %c2_9 = arith.constant 2 : index
    %c0_10 = arith.constant 0 : index
    %6 = vector.load %arg4[%c2_9, %c0_10] : memref<8x128xf32, #tpu.memory_space<vmem>>, vector<1x128xf32>
    %cst = arith.constant dense<0.000000e+00> : vector<128xf32>
    %7 = vector.multi_reduction <add>, %0, %cst [0] : vector<8x128xf32> to vector<128xf32>
    %8 = vector.shape_cast %7 : vector<128xf32> to vector<1x128xf32>
    %cst_11 = arith.constant 8.000000e+00 : f32
    %9 = vector.broadcast %cst_11 : f32 to vector<1x128xf32>
    %10 = arith.divf %8, %9 : vector<1x128xf32>
    %11 = vector.broadcast %10 : vector<1x128xf32> to vector<8x128xf32>
    %12 = arith.subf %0, %11 : vector<8x128xf32>
    %13 = arith.mulf %12, %12 : vector<8x128xf32>
    %cst_12 = arith.constant dense<0.000000e+00> : vector<128xf32>
    %14 = vector.multi_reduction <add>, %13, %cst_12 [0] : vector<8x128xf32> to vector<128xf32>
    %15 = vector.shape_cast %14 : vector<128xf32> to vector<1x128xf32>
    %cst_13 = arith.constant 8.000000e+00 : f32
    %16 = vector.broadcast %cst_13 : f32 to vector<1x128xf32>
    %17 = arith.divf %15, %16 : vector<1x128xf32>
    %cst_14 = arith.constant 9.99999974E-6 : f32
    %18 = vector.broadcast %cst_14 : f32 to vector<1x128xf32>
    %19 = arith.addf %17, %18 : vector<1x128xf32>
    %20 = math.rsqrt %19 : vector<1x128xf32>
    %21 = arith.mulf %1, %20 : vector<1x128xf32>
    %22 = arith.mulf %10, %21 : vector<1x128xf32>
    %23 = arith.subf %2, %22 : vector<1x128xf32>
    %24 = vector.broadcast %21 : vector<1x128xf32> to vector<8x128xf32>
    %25 = arith.mulf %0, %24 : vector<8x128xf32>
    %26 = vector.broadcast %23 : vector<1x128xf32> to vector<8x128xf32>
    %27 = arith.addf %25, %26 : vector<8x128xf32>
    %cst_15 = arith.constant 0.000000e+00 : f32
    %28 = vector.broadcast %cst_15 : f32 to vector<8x128xf32>
    %29 = arith.cmpf ogt, %27, %28 : vector<8x128xf32>
    %cst_16 = arith.constant 0.00999999977 : f32
    %30 = vector.broadcast %cst_16 : f32 to vector<8x128xf32>
    %31 = arith.mulf %30, %27 : vector<8x128xf32>
    %32 = arith.select %29, %27, %31 : vector<8x128xi1>, vector<8x128xf32>
    %c0_17 = arith.constant 0 : index
    %c0_18 = arith.constant 0 : index
    %33 = vector.load %arg1[%c0_17, %c0_18] : memref<128x128xf32, #tpu.memory_space<vmem>>, vector<128x128xf32>
    %cst_19 = arith.constant dense<0.000000e+00> : vector<8x128xf32>
    %34 = tpu.matmul %32, %33, %cst_19 {dimension_numbers = #tpu.dot_dimension_numbers<[1], [0], [0], [1], [0, 0, 1, 1], [], []>} : vector<8x128xf32>, vector<128x128xf32>, vector<8x128xf32> -> vector<8x128xf32>
    %35 = vector.broadcast %4 : vector<1x128xf32> to vector<8x128xf32>
    %36 = arith.addf %34, %35 : vector<8x128xf32>
    %cst_20 = arith.constant dense<0.000000e+00> : vector<128xf32>
    %37 = vector.multi_reduction <add>, %36, %cst_20 [0] : vector<8x128xf32> to vector<128xf32>
    %38 = vector.shape_cast %37 : vector<128xf32> to vector<1x128xf32>
    %cst_21 = arith.constant 8.000000e+00 : f32
    %39 = vector.broadcast %cst_21 : f32 to vector<1x128xf32>
    %40 = arith.divf %38, %39 : vector<1x128xf32>
    %41 = vector.broadcast %40 : vector<1x128xf32> to vector<8x128xf32>
    %42 = arith.subf %36, %41 : vector<8x128xf32>
    %43 = arith.mulf %42, %42 : vector<8x128xf32>
    %cst_22 = arith.constant dense<0.000000e+00> : vector<128xf32>
    %44 = vector.multi_reduction <add>, %43, %cst_22 [0] : vector<8x128xf32> to vector<128xf32>
    %45 = vector.shape_cast %44 : vector<128xf32> to vector<1x128xf32>
    %cst_23 = arith.constant 8.000000e+00 : f32
    %46 = vector.broadcast %cst_23 : f32 to vector<1x128xf32>
    %47 = arith.divf %45, %46 : vector<1x128xf32>
    %cst_24 = arith.constant 9.99999974E-6 : f32
    %48 = vector.broadcast %cst_24 : f32 to vector<1x128xf32>
    %49 = arith.addf %47, %48 : vector<1x128xf32>
    %50 = math.rsqrt %49 : vector<1x128xf32>
    %51 = arith.mulf %5, %50 : vector<1x128xf32>
    %52 = arith.mulf %40, %51 : vector<1x128xf32>
    %53 = arith.subf %6, %52 : vector<1x128xf32>
    %54 = vector.broadcast %51 : vector<1x128xf32> to vector<8x128xf32>
    %55 = arith.mulf %36, %54 : vector<8x128xf32>
    %56 = vector.broadcast %53 : vector<1x128xf32> to vector<8x128xf32>
    %57 = arith.addf %55, %56 : vector<8x128xf32>
    %cst_25 = arith.constant 0.000000e+00 : f32
    %58 = vector.broadcast %cst_25 : f32 to vector<8x128xf32>
    %59 = arith.cmpf ogt, %57, %58 : vector<8x128xf32>
    %cst_26 = arith.constant 0.00999999977 : f32
    %60 = vector.broadcast %cst_26 : f32 to vector<8x128xf32>
    %61 = arith.mulf %60, %57 : vector<8x128xf32>
    %62 = arith.select %59, %57, %61 : vector<8x128xi1>, vector<8x128xf32>
    %c0_27 = arith.constant 0 : index
    %c0_28 = arith.constant 0 : index
    %63 = vector.load %arg2[%c0_27, %c0_28] : memref<128x128xf32, #tpu.memory_space<vmem>>, vector<128x128xf32>
    %cst_29 = arith.constant dense<0.000000e+00> : vector<8x128xf32>
    %64 = tpu.matmul %62, %63, %cst_29 {dimension_numbers = #tpu.dot_dimension_numbers<[1], [0], [0], [1], [0, 0, 1, 1], [], []>} : vector<8x128xf32>, vector<128x128xf32>, vector<8x128xf32> -> vector<8x128xf32>
    %65 = vector.broadcast %3 : vector<1x128xf32> to vector<8x128xf32>
    %66 = arith.addf %64, %65 : vector<8x128xf32>
    %67 = arith.addf %66, %0 : vector<8x128xf32>
    %c0_30 = arith.constant 0 : index
    %c0_31 = arith.constant 0 : index
    %68 = vector.load %arg5[%c0_30, %c0_31] : memref<8x128xf32, #tpu.memory_space<vmem>>, vector<8x128xf32>
    tpu.vector_store %arg5[%c0_30, %c0_31], %67 {strides = array<i32>} : memref<8x128xf32, #tpu.memory_space<vmem>>, vector<8x128xf32>,
    return
  }
}

</mosaic_0001>

<bundles_post_ra>
// kernel: tpu_custom_call.1
= control target key start
LH: loop header
LB: loop body
LE: loop exit
PB: predicated region body
PF: predicated region fallthrough
CT: control target
= control target key end

     0   :  { %10 = vsyncpa [#allocation3], 0  ;;  %s521_s0 = inlined_call_operand.hbm [shape: f32[8,128], index: 0, kind: input, shape index: {}]   ;;  %s522_s1 = inlined_call_operand.hbm [shape: f32[128,128], index: 1, kind: input, shape index: {}]   ;;  %s523_s2 = inlined_call_operand.hbm [shape: f32[128,128], index: 2, kind: input, shape index: {}]   ;;  %s524_s3 = inlined_call_operand.hbm [shape: f32[8,128], index: 3, kind: input, shape index: {}]   ;;  %s525_s4 = inlined_call_operand.hbm [shape: f32[8,128], index: 4, kind: input, shape index: {}]   ;;  %s526_s5 = inlined_call_operand.hbm [shape: f32[8,128], index: 5, kind: output, shape index: {}]  }
   0x1   :  { %11 = vsyncpa [#allocation6], 0 }
   0x2   :  { %12 = vsyncpa [#allocation9], 0  ;;  %s29_s20 = sshll.u32 %s522_s1, 4  ;;  %s30_s20 = int_to_ptr.hbm [resolvable:$true] %s29_s20 }
   0x3   :  { %13 = vsyncpa [#allocation4], 0  ;;  %s445_s21 = smov [#allocation5]   ;;  %s56_s25 = sshll.u32 %s524_s3, 4  ;;  %s57_s25 = int_to_ptr.hbm [resolvable:$true] %s56_s25 }
   0x4   :  { %s31_s22 = sshll.u32 %s445_s21, 4  ;;  %s446_s26 = smov 128   ;;  %s32_s22 = int_to_ptr.vmem [resolvable:$true] %s31_s22 }
   0x5   :  { %s447_s27 = smov 8   ;;  %s448_s28 = smov [#allocation8]  }
   0x6   :  { %37 = dma.hbm_to_vmem [thread:$0]  %s30_s20, 2048, %s32_s22, [#allocation6], %s446_s26, %s446_s26, %s447_s27  }
   0x7   :  { %s58_s29 = sshll.u32 %s448_s28, 4  ;;  %s19_s7 = sshll.u32 %s521_s0, 4  ;;  %s59_s29 = int_to_ptr.vmem [resolvable:$true] %s58_s29  ;;  %s20_s7 = int_to_ptr.hbm [resolvable:$true] %s19_s7 }
   0x8   :  { %61 = dma.hbm_to_vmem [thread:$0]  %s57_s25, 128, %s59_s29, [#allocation9]  }
   0x9   :  { %s42_s9 = sshll.u32 %s523_s2, 4  ;;  %s449_s10 = smov [#allocation2]   ;;  %s43_s9 = int_to_ptr.hbm [resolvable:$true] %s42_s9 }
   0xa   :  { %s21_s11 = sshll.u32 %s449_s10, 4  ;;  %s450_s3 = smov [#allocation7]   ;;  %s22_s11 = int_to_ptr.vmem [resolvable:$true] %s21_s11 }
   0xb   :  { %24 = dma.hbm_to_vmem [thread:$0]  %s20_s7, 128, %s22_s11, [#allocation3]  }
   0xc   :  { %s44_s12 = sshll.u32 %s450_s3, 4  ;;  %s67_s15 = sshll.u32 %s525_s4, 4  ;;  %s45_s12 = int_to_ptr.vmem [resolvable:$true] %s44_s12  ;;  %s68_s15 = int_to_ptr.hbm [resolvable:$true] %s67_s15 }
   0xd   :  { %50 = dma.hbm_to_vmem [thread:$0]  %s43_s9, 2048, %s45_s12, [#allocation6], %s446_s26, %s446_s26, %s447_s27  }
   0xe   :  { %s451_s0 = smov [#allocation10]  }
   0xf   :  { %s69_s16 = sshll.u32 %s451_s0, 4  ;;  %s70_s16 = int_to_ptr.vmem [resolvable:$true] %s69_s16 }
  0x10   :  { %72 = dma.hbm_to_vmem [thread:$0]  %s68_s15, 128, %s70_s16, [#allocation9]  }
  0x11   :  { %437 = dma.done.wait [#allocation3], 128  }
  0x12   :  { %438 = vsyncadd [#allocation3], 4294967168 }
  0x13   :  { %439 = dma.done.wait [#allocation6], 4096  }
  0x14   :  { %440 = vsyncadd [#allocation6], 4294963200 }
  0x15   :  { %441 = dma.done.wait [#allocation9], 256  }
  0x16   :  { %442 = vsyncadd [#allocation9], 4294967040  ;;  %v452_v0 = vmov 8.0   ;;  %v159_v2 = vld [vmem:[#allocation5 + $0x78] sm:$0xff]  ;;  %v158_v3 = vld [vmem:[#allocation5 + $0x70] sm:$0xff]  ;;  %s453_s2 = smov [#allocation11]  }
  0x17   :  { %287 = vrcp.f32 %v452_v0  ;;  %161 = vmatpush.msra.mxu0 %v159_v2  ;;  %v157_v5 = vld [vmem:[#allocation5 + $0x68] sm:$0xff]  ;;  %v156_v7 = vld [vmem:[#allocation5 + $0x60] sm:$0xff]  ;;  %v499_v8 = vld [vmem:[#allocation2] sm:$0xff]  ;;  %s262_s4 = sshll.u32 %s453_s2, 4  ;;  %s264_s19 = sshll.u32 %s526_s5, 4  ;;  %s263_s4 = int_to_ptr.vmem [resolvable:$true] %s262_s4  ;;  %s265_s19 = int_to_ptr.hbm [resolvable:$true] %s264_s19 }
  0x18   :  { %v155_v9 = vld [vmem:[#allocation5 + $0x58] sm:$0xff]  ;;  %v100_v10 = vrot.slane %v499_v8, 4  ;;  %v154_v12 = vld [vmem:[#allocation5 + $0x50] sm:$0xff]  ;;  %v153_v14 = vld [vmem:[#allocation5 + $0x48] sm:$0xff] }
  0x19   :  { %162 = vmatpush.msra.mxu0 %v158_v3  ;;  %v152_v17 = vld [vmem:[#allocation5 + $0x40] sm:$0xff]  ;;  %v151_v19 = vld [vmem:[#allocation5 + $0x38] sm:$0xff]  ;;  %v150_v22 = vld [vmem:[#allocation5 + $0x30] sm:$0xff] }
  0x1a   :  { %v101_v13 = vadd.f32 %v100_v10, %v499_v8  ;;  %v149_v24 = vld [vmem:[#allocation5 + $0x28] sm:$0xff]  ;;  %v148_v26 = vld [vmem:[#allocation5 + $0x20] sm:$0xff]  ;;  %v147_v28 = vld [vmem:[#allocation5 + $0x18] sm:$0xff] }
  0x1b   :  { %163 = vmatpush.msra.mxu0 %v157_v5  ;;  %v146_v30 = vld [vmem:[#allocation5 + $0x10] sm:$0xff]  ;;  %v145_v32 = vld [vmem:[#allocation5 + $0x8] sm:$0xff]  ;;  %v144_v34 = vld [vmem:[#allocation5] sm:$0xff] }
  0x1c   :  { %v102_v15 = vrot.slane %v101_v13, 2  ;;  %v94_v46 = vld [vmem:[#allocation8] sm:$0x1]  ;;  %v95_v50 = vld [vmem:[#allocation8 + $0x1] sm:$0x1]  ;;  %v233_v63 = vld [vmem:[#allocation7 + $0x78] sm:$0xff] }
  0x1d   :  { %v288_v1 = vpop.eup %287  ;;  %164 = vmatpush.msra.mxu0 %v156_v7  ;;  %v285_v59 = vld [vmem:[#allocation10] ss:$0 sm:$0xff]  ;;  %235 = vmatpush.msra.mxu1 %v233_v63 }
  0x1e   :  { %v107_v4 = vmul.f32 8.0, %v288_v1  ;;  %v103_v18 = vadd.f32 %v102_v15, %v101_v13  ;;  %vm111_vm0 = vweird.f32 %v288_v1  ;;  %v231_v2 = vld [vmem:[#allocation7 + $0x68] sm:$0xff]  ;;  %v226_v13 = vld [vmem:[#allocation7 + $0x40] sm:$0xff]  ;;  %v225_v15 = vld [vmem:[#allocation7 + $0x38] sm:$0xff] }
  0x1f   :  { %165 = vmatpush.msra.mxu0 %v155_v9  ;;  %v228_v9 = vld [vmem:[#allocation7 + $0x50] sm:$0xff] }
  0x20   :  { %v108_v6 = vsub.f32 1.0, %v107_v4  ;;  %v104_v20 = vrot.slane %v103_v18, 1  ;;  %v230_v4 = vld [vmem:[#allocation7 + $0x60] sm:$0xff] }
  0x21   :  { %166 = vmatpush.msra.mxu0 %v154_v12 }
  0x22   :  { %v109_v11 = vmul.f32 %v288_v1, %v108_v6  ;;  %v105_v23 = vadd.f32 %v104_v20, %v103_v18  ;;  %v229_v6 = vld [vmem:[#allocation7 + $0x58] sm:$0xff] }
  0x23   :  { %167 = vmatpush.msra.mxu0 %v153_v14 }
  0x24   :  { %v110_v16 = vadd.f32 %v288_v1, %v109_v11  ;;  %v227_v11 = vld [vmem:[#allocation7 + $0x48] sm:$0xff] }
  0x25   :  { %168 = vmatpush.msra.mxu0 %v152_v17  ;;  %v224_v17 = vld [vmem:[#allocation7 + $0x30] sm:$0xff] }
  0x26   :  { %v503_v21 = vsel %vm111_vm0, %v288_v1, %v110_v16  ;;  %v232_v1 = vld [vmem:[#allocation7 + $0x70] sm:$0xff] }
  0x27   :  { %169 = vmatpush.msra.mxu0 %v151_v19  ;;  %v113_v25 = vmul.f32 %v503_v21, %v105_v23  ;;  %236 = vmatpush.msra.mxu1 %v232_v1  ;;  %v223_v19 = vld [vmem:[#allocation7 + $0x28] sm:$0xff] }
  0x29   :  { %170 = vmatpush.msra.mxu0 %v150_v22  ;;  %v114_v27 = vsub.f32 %v499_v8, %v113_v25  ;;  %237 = vmatpush.msra.mxu1 %v231_v2  ;;  %v222_v22 = vld [vmem:[#allocation7 + $0x20] sm:$0xff] }
  0x2b   :  { %171 = vmatpush.msra.mxu0 %v149_v24  ;;  %v115_v29 = vmul.f32 %v114_v27, %v114_v27  ;;  %238 = vmatpush.msra.mxu1 %v230_v4  ;;  %v221_v24 = vld [vmem:[#allocation7 + $0x18] sm:$0xff] }
  0x2d   :  { %172 = vmatpush.msra.mxu0 %v148_v26  ;;  %v116_v31 = vrot.slane %v115_v29, 4  ;;  %239 = vmatpush.msra.mxu1 %v229_v6  ;;  %v220_v26 = vld [vmem:[#allocation7 + $0x10] sm:$0xff] }
  0x2f   :  { %173 = vmatpush.msra.mxu0 %v147_v28  ;;  %v117_v33 = vadd.f32 %v116_v31, %v115_v29  ;;  %240 = vmatpush.msra.mxu1 %v228_v9  ;;  %v219_v28 = vld [vmem:[#allocation7 + $0x8] sm:$0xff] }
  0x31   :  { %174 = vmatpush.msra.mxu0 %v146_v30  ;;  %v118_v35 = vrot.slane %v117_v33, 2  ;;  %241 = vmatpush.msra.mxu1 %v227_v11  ;;  %v218_v30 = vld [vmem:[#allocation7] sm:$0xff] }
  0x33   :  { %175 = vmatpush.msra.mxu0 %v145_v32  ;;  %v119_v36 = vadd.f32 %v118_v35, %v117_v33  ;;  %242 = vmatpush.msra.mxu1 %v226_v13 }
  0x35   :  { %176 = vmatpush.msra.mxu0 %v144_v34  ;;  %v120_v37 = vrot.slane %v119_v36, 1  ;;  %243 = vmatpush.msra.mxu1 %v225_v15 }
  0x37   :  { %v121_v38 = vadd.f32 %v120_v37, %v119_v36  ;;  %244 = vmatpush.msra.mxu1 %v224_v17 }
  0x39   :  { %v122_v39 = vmul.f32 %v121_v38, %v503_v21  ;;  %245 = vmatpush.msra.mxu1 %v223_v19  ;;  %v98_v38 = vld [vmem:[#allocation10 + $0x1] sm:$0x1] }
  0x3b   :  { %v123_v40 = vadd.f32 1e-05, %v122_v39  ;;  %246 = vmatpush.msra.mxu1 %v222_v22 }
  0x3d   :  { %289 = vrsqrt.f32 %v123_v40  ;;  %vm130_vm1 = vweird.f32 %v123_v40  ;;  %247 = vmatpush.msra.mxu1 %v221_v24 }
  0x3f   :  { %248 = vmatpush.msra.mxu1 %v220_v26 }
  0x41   :  { %249 = vmatpush.msra.mxu1 %v219_v28 }
  0x43   :  { %v290_v41 = vpop.eup %289  ;;  %250 = vmatpush.msra.mxu1 %v218_v30 }
  0x44   :  { %v125_v42 = vmul.f32 %v290_v41, %v123_v40  ;;  %vm131_vm2 = vweird.f32 %v290_v41 }
  0x45   :  { %vm132_vm3 = vmor %vm130_vm1, %vm131_vm2 }
  0x46   :  { %v126_v43 = vmul.f32 %v290_v41, %v125_v42  ;;  %v99_v42 = vld [vmem:[#allocation10 + $0x2] sm:$0x1] }
  0x48   :  { %v127_v44 = vmul.f32 0.5, %v126_v43 }
  0x4a   :  { %v128_v45 = vsub.f32 1.5, %v127_v44 }
  0x4c   :  { %v129_v47 = vmul.f32 %v290_v41, %v128_v45 }
  0x4e   :  { %v133_v48 = vsel %vm132_vm3, %v290_v41, %v129_v47 }
  0x4f   :  { %v134_v49 = vmul.f32 %v133_v48, %v94_v46 }
  0x51   :  { %v135_v51 = vmul.f32 %v134_v49, %v113_v25  ;;  %v137_v52 = vperm.slane %v134_v49, 0 }
  0x53   :  { %v136_v53 = vsub.f32 %v95_v50, %v135_v51  ;;  %v138_v54 = vmul.f32 %v137_v52, %v499_v8  ;;  %v286_v50 = vld [vmem:[#allocation8 + $0x2] ss:$0 sm:$0xff] }
  0x55   :  { %v139_v55 = vperm.slane %v136_v53, 0 }
  0x57   :  { %v140_v56 = vadd.f32 %v139_v55, %v138_v54 }
  0x59   :  { %vm141_vm4 = vcmp.gt.f32.partialorder %v140_v56, 0.0  ;;  %v142_v57 = vmul.f32 0.01, %v140_v56 }
  0x5b   :  { %v143_v58 = vsel %vm141_vm4, %v140_v56, %v142_v57 }
  0x5c   :  { %177 = vmatmul.f32.vlgmr.msra.gmra.mxu0 %v143_v58 }
  0xd9   :  { %v178_v60 = vpop.f32.mrf.mxu0 }
  0xda   :  { %v509_v61 = vadd.f32 %v285_v59, %v178_v60 }
  0xdc   :  { %v181_v62 = vrot.slane %v509_v61, 4 }
  0xde   :  { %v182_v0 = vadd.f32 %v181_v62, %v509_v61 }
  0xe0   :  { %v183_v3 = vrot.slane %v182_v0, 2 }
  0xe2   :  { %v184_v5 = vadd.f32 %v183_v3, %v182_v0 }
  0xe4   :  { %v185_v7 = vrot.slane %v184_v5, 1 }
  0xe6   :  { %v186_v10 = vadd.f32 %v185_v7, %v184_v5 }
  0xe8   :  { %v187_v12 = vmul.f32 %v186_v10, %v503_v21 }
  0xea   :  { %v188_v14 = vsub.f32 %v509_v61, %v187_v12 }
  0xec   :  { %v189_v16 = vmul.f32 %v188_v14, %v188_v14 }
  0xee   :  { %v190_v18 = vrot.slane %v189_v16, 4 }
  0xf0   :  { %v191_v20 = vadd.f32 %v190_v18, %v189_v16 }
  0xf2   :  { %v192_v23 = vrot.slane %v191_v20, 2 }
  0xf4   :  { %v193_v25 = vadd.f32 %v192_v23, %v191_v20 }
  0xf6   :  { %v194_v27 = vrot.slane %v193_v25, 1 }
  0xf8   :  { %v195_v29 = vadd.f32 %v194_v27, %v193_v25 }
  0xfa   :  { %v196_v31 = vmul.f32 %v195_v29, %v503_v21 }
  0xfc   :  { %v197_v32 = vadd.f32 1e-05, %v196_v31 }
  0xfe   :  { %291 = vrsqrt.f32 %v197_v32  ;;  %vm204_vm6 = vweird.f32 %v197_v32 }
 0x104   :  { %v292_v33 = vpop.eup %291 }
 0x105   :  { %v199_v34 = vmul.f32 %v292_v33, %v197_v32  ;;  %vm205_vm5 = vweird.f32 %v292_v33 }
 0x106   :  { %vm206_vm7 = vmor %vm204_vm6, %vm205_vm5 }
 0x107   :  { %v200_v35 = vmul.f32 %v292_v33, %v199_v34 }
 0x109   :  { %v201_v36 = vmul.f32 0.5, %v200_v35 }
 0x10b   :  { %v202_v37 = vsub.f32 1.5, %v201_v36 }
 0x10d   :  { %v203_v39 = vmul.f32 %v292_v33, %v202_v37 }
 0x10f   :  { %v207_v40 = vsel %vm206_vm7, %v292_v33, %v203_v39 }
 0x110   :  { %v208_v41 = vmul.f32 %v207_v40, %v98_v38 }
 0x112   :  { %v209_v43 = vmul.f32 %v208_v41, %v187_v12  ;;  %v211_v44 = vperm.slane %v208_v41, 0 }
 0x114   :  { %v210_v21 = vsub.f32 %v99_v42, %v209_v43  ;;  %v212_v45 = vmul.f32 %v211_v44, %v509_v61 }
 0x116   :  { %v213_v46 = vperm.slane %v210_v21, 0 }
 0x118   :  { %v214_v47 = vadd.f32 %v213_v46, %v212_v45 }
 0x11a   :  { %vm215_vm8 = vcmp.gt.f32.partialorder %v214_v47, 0.0  ;;  %v216_v48 = vmul.f32 0.01, %v214_v47 }
 0x11c   :  { %v217_v49 = vsel %vm215_vm8, %v214_v47, %v216_v48 }
 0x11d   :  { %251 = vmatmul.f32.vlgmr.msra.gmra.mxu1 %v217_v49 }
 0x19a   :  { %v252_v51 = vpop.f32.mrf.mxu1 }
 0x19b   :  { %v253_v52 = vadd.f32 %v286_v50, %v252_v51 }
 0x19d   :  { %v255_v53 = vadd.f32 %v253_v52, %v499_v8 }
 0x19f   :  { %256 = vst [vmem:[#allocation11] sm:$0xff] %v255_v53 }
 0x1a0   :  { %267 = dma.vmem_to_hbm [thread:$0]  %s263_s4, 128, %s265_s19, [#allocation4]  }
 0x1a1   :  { %443 = dma.done.wait [#allocation4], 128  }
 0x1a2   :  { %444 = vsyncadd [#allocation4], 4294967168 }
 0x1a3   :  { %272 = vsyncpa [#allocation3], 1 }
 0x1a4   :  { %273 = vsyncpa [#allocation6], 1 }
 0x1a5   :  { %274 = vsyncpa [#allocation9], 1 }
 0x1a6   :  { %275 = vsyncpa [#allocation4], 1 }

</bundles_post_ra>
